<compile_context>
chip_gen: v6e
topology: v6e:2x2x1
jax: 0.10.0
libtpu: 0.0.40
codegen_flags: <defaults>
</compile_context>

<pallas_src>
import functools

import jax
import jax.numpy as jnp
from jax import lax
from jax.experimental import pallas as pl
from jax.experimental.pallas import tpu as pltpu


# ---------------------------------------------------------------------------
# Pallas kernel: tiled matmul (im2col conv) + folded-BN affine [+ residual] [+ relu]
# ---------------------------------------------------------------------------
def _matmul_bn_kernel(*refs, relu, has_residual):
    if has_residual:
        p_ref, w_ref, s_ref, b_ref, r_ref, o_ref, acc_ref = refs
    else:
        p_ref, w_ref, s_ref, b_ref, o_ref, acc_ref = refs
        r_ref = None

    k = pl.program_id(2)

    @pl.when(k == 0)
    def _init():
        acc_ref[...] = jnp.zeros_like(acc_ref)

    # bf16 x bf16 -> f32 accumulation on the MXU.
    acc_ref[...] += jnp.dot(p_ref[...], w_ref[...],
                            preferred_element_type=jnp.float32)

    # Epilogue only once per output tile (keeps VALU / store slots off the critical
    # path on v5e, and avoids re-writing the output block every K step).
    @pl.when(k == pl.num_programs(2) - 1)
    def _epilogue():
        y = acc_ref[...] * s_ref[...] + b_ref[...]
        if r_ref is not None:
            y = y + r_ref[...].astype(jnp.float32)
        if relu:
            y = jnp.maximum(y, 0.0)
        o_ref[...] = y.astype(o_ref.dtype)


def _round_up(x, m):
    return (x + m - 1) // m * m


def fused_conv_bn(patches, w_mat, scale, bias, residual=None, relu=False,
                  out_dtype=jnp.float32):
    """Tiled Pallas call: (M,K)@(K,C) + per-channel affine (+ residual) (+ relu)."""
    M, K = patches.shape
    C = w_mat.shape[1]

    # Pad everything to lane/sublane friendly multiples of 128.
    Mp = _round_up(M, 128)
    Kp = _round_up(K, 128)
    Cp = _round_up(C, 128)

    # Tile sizes: grow toward MXU-friendly 256-wide tiles when shapes allow.
    # Worst-case VMEM (double-buffered bf16 inputs + f32 residual/acc/out) stays < ~4 MiB,
    # which fits v5e/v6e (128 MiB) and v7x (64 MiB) comfortably.
    tm = 512 if Mp % 512 == 0 else (256 if Mp % 256 == 0 else 128)
    tn = 256 if Cp % 256 == 0 else 128
    tk = 256 if Kp % 256 == 0 else 128

    # bf16 MXU inputs; zero padding keeps the extra K columns/rows inert.
    p = jnp.pad(patches.astype(jnp.bfloat16), ((0, Mp - M), (0, Kp - K)))
    w = jnp.pad(w_mat.astype(jnp.bfloat16), ((0, Kp - K), (0, Cp - C)))
    s = jnp.pad(scale.astype(jnp.float32), (0, Cp - C))[None, :]
    b = jnp.pad(bias.astype(jnp.float32), (0, Cp - C))[None, :]

    inputs = [p, w, s, b]
    in_specs = [
        pl.BlockSpec((tm, tk), lambda i, j, k: (i, k)),
        pl.BlockSpec((tk, tn), lambda i, j, k: (k, j)),
        pl.BlockSpec((1, tn), lambda i, j, k: (0, j)),
        pl.BlockSpec((1, tn), lambda i, j, k: (0, j)),
    ]
    if residual is not None:
        r = jnp.pad(residual.astype(jnp.float32), ((0, Mp - M), (0, Cp - C)))
        inputs.append(r)
        in_specs.append(pl.BlockSpec((tm, tn), lambda i, j, k: (i, j)))

    kernel = functools.partial(_matmul_bn_kernel, relu=relu,
                               has_residual=residual is not None)

    out_itemsize = jnp.dtype(out_dtype).itemsize
    bytes_accessed = (p.size * 2 + w.size * 2 + Mp * Cp * out_itemsize
                      + (Mp * Cp * 4 if residual is not None else 0))

    out = pl.pallas_call(
        kernel,
        out_shape=jax.ShapeDtypeStruct((Mp, Cp), out_dtype),
        grid_spec=pltpu.PrefetchScalarGridSpec(
            num_scalar_prefetch=0,
            grid=(Mp // tm, Cp // tn, Kp // tk),
            in_specs=in_specs,
            out_specs=pl.BlockSpec((tm, tn), lambda i, j, k: (i, j)),
            scratch_shapes=[pltpu.VMEM((tm, tn), jnp.float32)],
        ),
        compiler_params=pltpu.CompilerParams(
            dimension_semantics=("parallel", "parallel", "arbitrary"),
            vmem_limit_bytes=48 * 1024 * 1024,
        ),
        cost_estimate=pl.CostEstimate(
            flops=2 * Mp * Kp * Cp,
            transcendentals=0,
            bytes_accessed=int(bytes_accessed),
        ),
    )(*inputs)
    return out[:M, :C]


# ---------------------------------------------------------------------------
# JAX glue: im2col, weight re-layout, BN folding
# ---------------------------------------------------------------------------
def im2col(x_nhwc, ksize, stride, pad):
    N, H, W, C = x_nhwc.shape
    xp = jnp.pad(x_nhwc, ((0, 0), (pad, pad), (pad, pad), (0, 0)))
    Ho = (H + 2 * pad - ksize) // stride + 1
    Wo = (W + 2 * pad - ksize) // stride + 1
    cols = []
    for ky in range(ksize):
        for kx in range(ksize):
            cols.append(xp[:, ky:ky + stride * Ho:stride, kx:kx + stride * Wo:stride, :])
    patches = jnp.stack(cols, axis=3)  # (N, Ho, Wo, k*k, C) — order (ky, kx, c)
    return patches.reshape(N * Ho * Wo, ksize * ksize * C), Ho, Wo


def oihw_to_mat(w_oihw):
    cout, cin, kh, kw = w_oihw.shape
    return jnp.transpose(w_oihw, (2, 3, 1, 0)).reshape(kh * kw * cin, cout)


def fold_bn(conv_bias, gamma, beta, mean, var, eps=1e-5):
    scale = gamma / jnp.sqrt(var + eps)
    bias = beta + scale * (conv_bias - mean)
    return scale, bias


def resnet_block_forward(x_nchw, params, stride):
    x = jnp.transpose(x_nchw, (0, 2, 3, 1)).astype(jnp.float32)  # NHWC
    N, H, W, Cin = x.shape
    Cout = params["w1"].shape[0]

    # conv1 (3x3, stride) + bn1 + relu  -> intermediate kept in bf16 (MXU dtype anyway)
    p1, Ho, Wo = im2col(x, 3, stride, 1)
    w1 = oihw_to_mat(params["w1"])
    s1, b1 = fold_bn(params["b1"], params["bn1_gamma"], params["bn1_beta"],
                     params["bn1_mean"], params["bn1_var"])
    out1 = fused_conv_bn(p1, w1, s1, b1, relu=True, out_dtype=jnp.bfloat16)
    out1_nhwc = out1.reshape(N, Ho, Wo, Cout)

    # shortcut: 1x1 conv (stride) + bn when channel counts differ, else identity
    # (mirrors the PyTorch module, whose identity branch is only valid for stride == 1).
    if Cout != Cin:
        xs = x[:, ::stride, ::stride, :][:, :Ho, :Wo, :].reshape(N * Ho * Wo, Cin)
        we = oihw_to_mat(params["we"])
        se, be = fold_bn(params["be"], params["bne_gamma"], params["bne_beta"],
                         params["bne_mean"], params["bne_var"])
        shortcut = fused_conv_bn(xs, we, se, be, relu=False, out_dtype=jnp.float32)
    else:
        shortcut = x.reshape(N * H * W, Cin)

    # conv2 (3x3, stride 1) + bn2 + residual add + relu, all fused in one tiled kernel
    p2, _, _ = im2col(out1_nhwc, 3, 1, 1)
    w2 = oihw_to_mat(params["w2"])
    s2, b2 = fold_bn(params["b2"], params["bn2_gamma"], params["bn2_beta"],
                     params["bn2_mean"], params["bn2_var"])
    out = fused_conv_bn(p2, w2, s2, b2, residual=shortcut, relu=True,
                        out_dtype=jnp.float32)
    out = out.reshape(N, Ho, Wo, Cout)
    return jnp.transpose(out, (0, 3, 1, 2))  # back to NCHW


# ---------------------------------------------------------------------------
# Pure-JAX reference for correctness check
# ---------------------------------------------------------------------------
def reference_forward(x, params, stride, eps=1e-5):
    def conv(x, w, b, s, pad):
        y = lax.conv_general_dilated(x, w, (s, s), [(pad, pad), (pad, pad)],
                                     dimension_numbers=("NCHW", "OIHW", "NCHW"))
        return y + b[None, :, None, None]

    def bn(x, g, be, m, v):
        return (g[None, :, None, None] * (x - m[None, :, None, None])
                / jnp.sqrt(v[None, :, None, None] + eps) + be[None, :, None, None])

    out = jax.nn.relu(bn(conv(x, params["w1"], params["b1"], stride, 1),
                         params["bn1_gamma"], params["bn1_beta"],
                         params["bn1_mean"], params["bn1_var"]))
    out = bn(conv(out, params["w2"], params["b2"], 1, 1),
             params["bn2_gamma"], params["bn2_beta"],
             params["bn2_mean"], params["bn2_var"])
    cout, cin = params["w1"].shape[0], params["w1"].shape[1]
    if cout != cin:
        sc = bn(conv(x, params["we"], params["be"], stride, 0),
                params["bne_gamma"], params["bne_beta"],
                params["bne_mean"], params["bne_var"])
    else:
        sc = x
    return jax.nn.relu(sc + out)


# ---------------------------------------------------------------------------
# Deterministic parameter construction
# ---------------------------------------------------------------------------
def make_params(key, channel_in, channel_out):
    ks = jax.random.split(key, 16)
    p = {
        "w1": jax.random.normal(ks[0], (channel_out, channel_in, 3, 3), jnp.float32) * 0.1,
        "b1": jax.random.normal(ks[1], (channel_out,), jnp.float32) * 0.01,
        "bn1_gamma": jax.random.uniform(ks[2], (channel_out,), jnp.float32, 0.5, 1.5),
        "bn1_beta": jax.random.normal(ks[3], (channel_out,), jnp.float32) * 0.1,
        "bn1_mean": jax.random.normal(ks[4], (channel_out,), jnp.float32) * 0.1,
        "bn1_var": jax.random.uniform(ks[5], (channel_out,), jnp.float32, 0.5, 1.5),
        "w2": jax.random.normal(ks[6], (channel_out, channel_out, 3, 3), jnp.float32) * 0.1,
        "b2": jax.random.normal(ks[7], (channel_out,), jnp.float32) * 0.01,
        "bn2_gamma": jax.random.uniform(ks[8], (channel_out,), jnp.float32, 0.5, 1.5),
        "bn2_beta": jax.random.normal(ks[9], (channel_out,), jnp.float32) * 0.1,
        "bn2_mean": jax.random.normal(ks[10], (channel_out,), jnp.float32) * 0.1,
        "bn2_var": jax.random.uniform(ks[11], (channel_out,), jnp.float32, 0.5, 1.5),
    }
    if channel_out != channel_in:
        p.update({
            "we": jax.random.normal(ks[12], (channel_out, channel_in, 1, 1), jnp.float32) * 0.1,
            "be": jax.random.normal(ks[13], (channel_out,), jnp.float32) * 0.01,
            "bne_gamma": jax.random.uniform(ks[14], (channel_out,), jnp.float32, 0.5, 1.5),
            "bne_beta": jax.random.normal(ks[15], (channel_out,), jnp.float32) * 0.1,
            "bne_mean": jnp.zeros((channel_out,), jnp.float32),
            "bne_var": jnp.ones((channel_out,), jnp.float32),
        })
    return p


if __name__ == "__main__":
    N, C_IN, C_OUT, HW, STRIDE = 2, 4, 8, 16, 2

    key = jax.random.PRNGKey(0)
    kx, kp = jax.random.split(key)
    x = jax.random.normal(kx, (N, C_IN, HW, HW), jnp.float32)
    params = make_params(kp, C_IN, C_OUT)

    fwd = jax.jit(resnet_block_forward, static_argnums=2)
    out = jax.block_until_ready(fwd(x, params, STRIDE))

    ref = jax.block_until_ready(reference_forward(x, params, STRIDE))
    assert out.shape == ref.shape, (out.shape, ref.shape)
    # bf16 MXU inputs with f32 accumulation: max abs error measured well below this bound.
    assert jnp.allclose(out, ref, rtol=3e-2, atol=3e-2), float(jnp.max(jnp.abs(out - ref)))

    print("KERNEL_OK")
</pallas_src>

<mosaic_0001>
module attributes {stable_mosaic.version = 11 : i64} {
  func.func @_matmul_bn_kernel(%arg0: i32, %arg1: i32, %arg2: i32, %arg3: memref<128x128xbf16, #tpu.memory_space<vmem>>, %arg4: memref<128x128xbf16, #tpu.memory_space<vmem>>, %arg5: memref<1x128xf32, #tpu.memory_space<vmem>>, %arg6: memref<1x128xf32, #tpu.memory_space<vmem>>, %arg7: memref<128x128xbf16, #tpu.memory_space<vmem>>, %arg8: memref<128x128xf32, #tpu.memory_space<vmem>>) attributes {dimension_semantics = [#tpu.dimension_semantics<parallel>, #tpu.dimension_semantics<parallel>, #tpu.dimension_semantics<arbitrary>], iteration_bounds = array<i64: 1, 1, 1>, scalar_prefetch = 0 : i64, scratch_operands = 1 : i64, tpu.core_type = #tpu.core_type<tc>, window_params = [{transform_indices = @transform_0, window_bounds = array<i64: 128, 128>}, {transform_indices = @transform_1, window_bounds = array<i64: 128, 128>}, {transform_indices = @transform_2, window_bounds = array<i64: 1, 128>}, {transform_indices = @transform_3, window_bounds = array<i64: 1, 128>}, {transform_indices = @transform_4, window_bounds = array<i64: 128, 128>}]} {
    %c0_i32 = arith.constant 0 : i32
    %0 = arith.cmpi eq, %arg2, %c0_i32 : i32
    %1 = arith.extui %0 : i1 to i32
    %c0_i32_0 = arith.constant 0 : i32
    %2 = arith.cmpi ne, %1, %c0_i32_0 : i32
    scf.if %2 {
      %cst_10 = arith.constant 0.000000e+00 : f32
      %12 = vector.broadcast %cst_10 : f32 to vector<128x128xf32>
      %c0_11 = arith.constant 0 : index
      %c0_12 = arith.constant 0 : index
      %13 = vector.load %arg8[%c0_11, %c0_12] : memref<128x128xf32, #tpu.memory_space<vmem>>, vector<128x128xf32>
      tpu.vector_store %arg8[%c0_11, %c0_12], %12 {strides = array<i32>} : memref<128x128xf32, #tpu.memory_space<vmem>>, vector<128x128xf32>,
    } else {
    }
    %c0 = arith.constant 0 : index
    %c0_1 = arith.constant 0 : index
    %3 = vector.load %arg8[%c0, %c0_1] : memref<128x128xf32, #tpu.memory_space<vmem>>, vector<128x128xf32>
    %c0_2 = arith.constant 0 : index
    %c0_3 = arith.constant 0 : index
    %4 = vector.load %arg3[%c0_2, %c0_3] : memref<128x128xbf16, #tpu.memory_space<vmem>>, vector<128x128xbf16>
    %c0_4 = arith.constant 0 : index
    %c0_5 = arith.constant 0 : index
    %5 = vector.load %arg4[%c0_4, %c0_5] : memref<128x128xbf16, #tpu.memory_space<vmem>>, vector<128x128xbf16>
    %cst = arith.constant dense<0.000000e+00> : vector<128x128xf32>
    %6 = tpu.matmul %4, %5, %cst {dimension_numbers = #tpu.dot_dimension_numbers<[1], [0], [0], [1], [0, 0, 1, 1], [], []>} : vector<128x128xbf16>, vector<128x128xbf16>, vector<128x128xf32> -> vector<128x128xf32>
    %7 = arith.addf %3, %6 : vector<128x128xf32>
    %c0_6 = arith.constant 0 : index
    %c0_7 = arith.constant 0 : index
    %8 = vector.load %arg8[%c0_6, %c0_7] : memref<128x128xf32, #tpu.memory_space<vmem>>, vector<128x128xf32>
    tpu.vector_store %arg8[%c0_6, %c0_7], %7 {strides = array<i32>} : memref<128x128xf32, #tpu.memory_space<vmem>>, vector<128x128xf32>,
    %c0_i32_8 = arith.constant 0 : i32
    %9 = arith.cmpi eq, %arg2, %c0_i32_8 : i32
    %10 = arith.extui %9 : i1 to i32
    %c0_i32_9 = arith.constant 0 : i32
    %11 = arith.cmpi ne, %10, %c0_i32_9 : i32
    scf.if %11 {
      %c0_10 = arith.constant 0 : index
      %c0_11 = arith.constant 0 : index
      %12 = vector.load %arg8[%c0_10, %c0_11] : memref<128x128xf32, #tpu.memory_space<vmem>>, vector<128x128xf32>
      %c0_12 = arith.constant 0 : index
      %c0_13 = arith.constant 0 : index
      %13 = vector.load %arg5[%c0_12, %c0_13] : memref<1x128xf32, #tpu.memory_space<vmem>>, vector<1x128xf32>
      %14 = vector.broadcast %13 : vector<1x128xf32> to vector<128x128xf32>
      %15 = arith.mulf %12, %14 : vector<128x128xf32>
      %c0_14 = arith.constant 0 : index
      %c0_15 = arith.constant 0 : index
      %16 = vector.load %arg6[%c0_14, %c0_15] : memref<1x128xf32, #tpu.memory_space<vmem>>, vector<1x128xf32>
      %17 = vector.broadcast %16 : vector<1x128xf32> to vector<128x128xf32>
      %18 = arith.addf %15, %17 : vector<128x128xf32>
      %cst_16 = arith.constant 0.000000e+00 : f32
      %19 = vector.broadcast %cst_16 : f32 to vector<128x128xf32>
      %20 = arith.maximumf %18, %19 : vector<128x128xf32>
      %21 = arith.truncf %20 : vector<128x128xf32> to vector<128x128xbf16>
      %c0_17 = arith.constant 0 : index
      %c0_18 = arith.constant 0 : index
      %22 = vector.load %arg7[%c0_17, %c0_18] : memref<128x128xbf16, #tpu.memory_space<vmem>>, vector<128x128xbf16>
      tpu.vector_store %arg7[%c0_17, %c0_18], %21 {strides = array<i32>} : memref<128x128xbf16, #tpu.memory_space<vmem>>, vector<128x128xbf16>,
    } else {
    }
    return
  }
  func.func @transform_0(%arg0: i32, %arg1: i32, %arg2: i32) -> (i32, i32) {
    %c0_i32 = arith.constant 0 : i32
    return %arg0, %arg2 : i32, i32
  }
  func.func @transform_1(%arg0: i32, %arg1: i32, %arg2: i32) -> (i32, i32) {
    %c0_i32 = arith.constant 0 : i32
    return %arg2, %arg1 : i32, i32
  }
  func.func @transform_2(%arg0: i32, %arg1: i32, %arg2: i32) -> (i32, i32) {
    %c0_i32 = arith.constant 0 : i32
    %c0_i32_0 = arith.constant 0 : i32
    return %c0_i32, %arg1 : i32, i32
  }
  func.func @transform_3(%arg0: i32, %arg1: i32, %arg2: i32) -> (i32, i32) {
    %c0_i32 = arith.constant 0 : i32
    %c0_i32_0 = arith.constant 0 : i32
    return %c0_i32, %arg1 : i32, i32
  }
  func.func @transform_4(%arg0: i32, %arg1: i32, %arg2: i32) -> (i32, i32) {
    %c0_i32 = arith.constant 0 : i32
    return %arg0, %arg1 : i32, i32
  }
}

module attributes {stable_mosaic.version = 11 : i64} {
  func.func @_matmul_bn_kernel(%arg0: i32, %arg1: i32, %arg2: i32, %arg3: memref<128x128xbf16, #tpu.memory_space<vmem>>, %arg4: memref<128x128xbf16, #tpu.memory_space<vmem>>, %arg5: memref<1x128xf32, #tpu.memory_space<vmem>>, %arg6: memref<1x128xf32, #tpu.memory_space<vmem>>, %arg7: memref<128x128xf32, #tpu.memory_space<vmem>>, %arg8: memref<128x128xf32, #tpu.memory_space<vmem>>) attributes {dimension_semantics = [#tpu.dimension_semantics<parallel>, #tpu.dimension_semantics<parallel>, #tpu.dimension_semantics<arbitrary>], iteration_bounds = array<i64: 1, 1, 1>, scalar_prefetch = 0 : i64, scratch_operands = 1 : i64, tpu.core_type = #tpu.core_type<tc>, window_params = [{transform_indices = @transform_0, window_bounds = array<i64: 128, 128>}, {transform_indices = @transform_1, window_bounds = array<i64: 128, 128>}, {transform_indices = @transform_2, window_bounds = array<i64: 1, 128>}, {transform_indices = @transform_3, window_bounds = array<i64: 1, 128>}, {transform_indices = @transform_4, window_bounds = array<i64: 128, 128>}]} {
    %c0_i32 = arith.constant 0 : i32
    %0 = arith.cmpi eq, %arg2, %c0_i32 : i32
    %1 = arith.extui %0 : i1 to i32
    %c0_i32_0 = arith.constant 0 : i32
    %2 = arith.cmpi ne, %1, %c0_i32_0 : i32
    scf.if %2 {
      %cst_10 = arith.constant 0.000000e+00 : f32
      %12 = vector.broadcast %cst_10 : f32 to vector<128x128xf32>
      %c0_11 = arith.constant 0 : index
      %c0_12 = arith.constant 0 : index
      %13 = vector.load %arg8[%c0_11, %c0_12] : memref<128x128xf32, #tpu.memory_space<vmem>>, vector<128x128xf32>
      tpu.vector_store %arg8[%c0_11, %c0_12], %12 {strides = array<i32>} : memref<128x128xf32, #tpu.memory_space<vmem>>, vector<128x128xf32>,
    } else {
    }
    %c0 = arith.constant 0 : index
    %c0_1 = arith.constant 0 : index
    %3 = vector.load %arg8[%c0, %c0_1] : memref<128x128xf32, #tpu.memory_space<vmem>>, vector<128x128xf32>
    %c0_2 = arith.constant 0 : index
    %c0_3 = arith.constant 0 : index
    %4 = vector.load %arg3[%c0_2, %c0_3] : memref<128x128xbf16, #tpu.memory_space<vmem>>, vector<128x128xbf16>
    %c0_4 = arith.constant 0 : index
    %c0_5 = arith.constant 0 : index
    %5 = vector.load %arg4[%c0_4, %c0_5] : memref<128x128xbf16, #tpu.memory_space<vmem>>, vector<128x128xbf16>
    %cst = arith.constant dense<0.000000e+00> : vector<128x128xf32>
    %6 = tpu.matmul %4, %5, %cst {dimension_numbers = #tpu.dot_dimension_numbers<[1], [0], [0], [1], [0, 0, 1, 1], [], []>} : vector<128x128xbf16>, vector<128x128xbf16>, vector<128x128xf32> -> vector<128x128xf32>
    %7 = arith.addf %3, %6 : vector<128x128xf32>
    %c0_6 = arith.constant 0 : index
    %c0_7 = arith.constant 0 : index
    %8 = vector.load %arg8[%c0_6, %c0_7] : memref<128x128xf32, #tpu.memory_space<vmem>>, vector<128x128xf32>
    tpu.vector_store %arg8[%c0_6, %c0_7], %7 {strides = array<i32>} : memref<128x128xf32, #tpu.memory_space<vmem>>, vector<128x128xf32>,
    %c0_i32_8 = arith.constant 0 : i32
    %9 = arith.cmpi eq, %arg2, %c0_i32_8 : i32
    %10 = arith.extui %9 : i1 to i32
    %c0_i32_9 = arith.constant 0 : i32
    %11 = arith.cmpi ne, %10, %c0_i32_9 : i32
    scf.if %11 {
      %c0_10 = arith.constant 0 : index
      %c0_11 = arith.constant 0 : index
      %12 = vector.load %arg8[%c0_10, %c0_11] : memref<128x128xf32, #tpu.memory_space<vmem>>, vector<128x128xf32>
      %c0_12 = arith.constant 0 : index
      %c0_13 = arith.constant 0 : index
      %13 = vector.load %arg5[%c0_12, %c0_13] : memref<1x128xf32, #tpu.memory_space<vmem>>, vector<1x128xf32>
      %14 = vector.broadcast %13 : vector<1x128xf32> to vector<128x128xf32>
      %15 = arith.mulf %12, %14 : vector<128x128xf32>
      %c0_14 = arith.constant 0 : index
      %c0_15 = arith.constant 0 : index
      %16 = vector.load %arg6[%c0_14, %c0_15] : memref<1x128xf32, #tpu.memory_space<vmem>>, vector<1x128xf32>
      %17 = vector.broadcast %16 : vector<1x128xf32> to vector<128x128xf32>
      %18 = arith.addf %15, %17 : vector<128x128xf32>
      %c0_16 = arith.constant 0 : index
      %c0_17 = arith.constant 0 : index
      %19 = vector.load %arg7[%c0_16, %c0_17] : memref<128x128xf32, #tpu.memory_space<vmem>>, vector<128x128xf32>
      tpu.vector_store %arg7[%c0_16, %c0_17], %18 {strides = array<i32>} : memref<128x128xf32, #tpu.memory_space<vmem>>, vector<128x128xf32>,
    } else {
    }
    return
  }
  func.func @transform_0(%arg0: i32, %arg1: i32, %arg2: i32) -> (i32, i32) {
    %c0_i32 = arith.constant 0 : i32
    return %arg0, %arg2 : i32, i32
  }
  func.func @transform_1(%arg0: i32, %arg1: i32, %arg2: i32) -> (i32, i32) {
    %c0_i32 = arith.constant 0 : i32
    return %arg2, %arg1 : i32, i32
  }
  func.func @transform_2(%arg0: i32, %arg1: i32, %arg2: i32) -> (i32, i32) {
    %c0_i32 = arith.constant 0 : i32
    %c0_i32_0 = arith.constant 0 : i32
    return %c0_i32, %arg1 : i32, i32
  }
  func.func @transform_3(%arg0: i32, %arg1: i32, %arg2: i32) -> (i32, i32) {
    %c0_i32 = arith.constant 0 : i32
    %c0_i32_0 = arith.constant 0 : i32
    return %c0_i32, %arg1 : i32, i32
  }
  func.func @transform_4(%arg0: i32, %arg1: i32, %arg2: i32) -> (i32, i32) {
    %c0_i32 = arith.constant 0 : i32
    return %arg0, %arg1 : i32, i32
  }
}

module attributes {stable_mosaic.version = 11 : i64} {
  func.func @_matmul_bn_kernel(%arg0: i32, %arg1: i32, %arg2: i32, %arg3: memref<128x128xbf16, #tpu.memory_space<vmem>>, %arg4: memref<128x128xbf16, #tpu.memory_space<vmem>>, %arg5: memref<1x128xf32, #tpu.memory_space<vmem>>, %arg6: memref<1x128xf32, #tpu.memory_space<vmem>>, %arg7: memref<128x128xf32, #tpu.memory_space<vmem>>, %arg8: memref<128x128xf32, #tpu.memory_space<vmem>>, %arg9: memref<128x128xf32, #tpu.memory_space<vmem>>) attributes {dimension_semantics = [#tpu.dimension_semantics<parallel>, #tpu.dimension_semantics<parallel>, #tpu.dimension_semantics<arbitrary>], iteration_bounds = array<i64: 1, 1, 1>, scalar_prefetch = 0 : i64, scratch_operands = 1 : i64, tpu.core_type = #tpu.core_type<tc>, window_params = [{transform_indices = @transform_0, window_bounds = array<i64: 128, 128>}, {transform_indices = @transform_1, window_bounds = array<i64: 128, 128>}, {transform_indices = @transform_2, window_bounds = array<i64: 1, 128>}, {transform_indices = @transform_3, window_bounds = array<i64: 1, 128>}, {transform_indices = @transform_4, window_bounds = array<i64: 128, 128>}, {transform_indices = @transform_5, window_bounds = array<i64: 128, 128>}]} {
    %c0_i32 = arith.constant 0 : i32
    %0 = arith.cmpi eq, %arg2, %c0_i32 : i32
    %1 = arith.extui %0 : i1 to i32
    %c0_i32_0 = arith.constant 0 : i32
    %2 = arith.cmpi ne, %1, %c0_i32_0 : i32
    scf.if %2 {
      %cst_10 = arith.constant 0.000000e+00 : f32
      %12 = vector.broadcast %cst_10 : f32 to vector<128x128xf32>
      %c0_11 = arith.constant 0 : index
      %c0_12 = arith.constant 0 : index
      %13 = vector.load %arg9[%c0_11, %c0_12] : memref<128x128xf32, #tpu.memory_space<vmem>>, vector<128x128xf32>
      tpu.vector_store %arg9[%c0_11, %c0_12], %12 {strides = array<i32>} : memref<128x128xf32, #tpu.memory_space<vmem>>, vector<128x128xf32>,
    } else {
    }
    %c0 = arith.constant 0 : index
    %c0_1 = arith.constant 0 : index
    %3 = vector.load %arg9[%c0, %c0_1] : memref<128x128xf32, #tpu.memory_space<vmem>>, vector<128x128xf32>
    %c0_2 = arith.constant 0 : index
    %c0_3 = arith.constant 0 : index
    %4 = vector.load %arg3[%c0_2, %c0_3] : memref<128x128xbf16, #tpu.memory_space<vmem>>, vector<128x128xbf16>
    %c0_4 = arith.constant 0 : index
    %c0_5 = arith.constant 0 : index
    %5 = vector.load %arg4[%c0_4, %c0_5] : memref<128x128xbf16, #tpu.memory_space<vmem>>, vector<128x128xbf16>
    %cst = arith.constant dense<0.000000e+00> : vector<128x128xf32>
    %6 = tpu.matmul %4, %5, %cst {dimension_numbers = #tpu.dot_dimension_numbers<[1], [0], [0], [1], [0, 0, 1, 1], [], []>} : vector<128x128xbf16>, vector<128x128xbf16>, vector<128x128xf32> -> vector<128x128xf32>
    %7 = arith.addf %3, %6 : vector<128x128xf32>
    %c0_6 = arith.constant 0 : index
    %c0_7 = arith.constant 0 : index
    %8 = vector.load %arg9[%c0_6, %c0_7] : memref<128x128xf32, #tpu.memory_space<vmem>>, vector<128x128xf32>
    tpu.vector_store %arg9[%c0_6, %c0_7], %7 {strides = array<i32>} : memref<128x128xf32, #tpu.memory_space<vmem>>, vector<128x128xf32>,
    %c0_i32_8 = arith.constant 0 : i32
    %9 = arith.cmpi eq, %arg2, %c0_i32_8 : i32
    %10 = arith.extui %9 : i1 to i32
    %c0_i32_9 = arith.constant 0 : i32
    %11 = arith.cmpi ne, %10, %c0_i32_9 : i32
    scf.if %11 {
      %c0_10 = arith.constant 0 : index
      %c0_11 = arith.constant 0 : index
      %12 = vector.load %arg9[%c0_10, %c0_11] : memref<128x128xf32, #tpu.memory_space<vmem>>, vector<128x128xf32>
      %c0_12 = arith.constant 0 : index
      %c0_13 = arith.constant 0 : index
      %13 = vector.load %arg5[%c0_12, %c0_13] : memref<1x128xf32, #tpu.memory_space<vmem>>, vector<1x128xf32>
      %14 = vector.broadcast %13 : vector<1x128xf32> to vector<128x128xf32>
      %15 = arith.mulf %12, %14 : vector<128x128xf32>
      %c0_14 = arith.constant 0 : index
      %c0_15 = arith.constant 0 : index
      %16 = vector.load %arg6[%c0_14, %c0_15] : memref<1x128xf32, #tpu.memory_space<vmem>>, vector<1x128xf32>
      %17 = vector.broadcast %16 : vector<1x128xf32> to vector<128x128xf32>
      %18 = arith.addf %15, %17 : vector<128x128xf32>
      %c0_16 = arith.constant 0 : index
      %c0_17 = arith.constant 0 : index
      %19 = vector.load %arg7[%c0_16, %c0_17] : memref<128x128xf32, #tpu.memory_space<vmem>>, vector<128x128xf32>
      %20 = arith.addf %18, %19 : vector<128x128xf32>
      %cst_18 = arith.constant 0.000000e+00 : f32
      %21 = vector.broadcast %cst_18 : f32 to vector<128x128xf32>
      %22 = arith.maximumf %20, %21 : vector<128x128xf32>
      %c0_19 = arith.constant 0 : index
      %c0_20 = arith.constant 0 : index
      %23 = vector.load %arg8[%c0_19, %c0_20] : memref<128x128xf32, #tpu.memory_space<vmem>>, vector<128x128xf32>
      tpu.vector_store %arg8[%c0_19, %c0_20], %22 {strides = array<i32>} : memref<128x128xf32, #tpu.memory_space<vmem>>, vector<128x128xf32>,
    } else {
    }
    return
  }
  func.func @transform_0(%arg0: i32, %arg1: i32, %arg2: i32) -> (i32, i32) {
    %c0_i32 = arith.constant 0 : i32
    return %arg0, %arg2 : i32, i32
  }
  func.func @transform_1(%arg0: i32, %arg1: i32, %arg2: i32) -> (i32, i32) {
    %c0_i32 = arith.constant 0 : i32
    return %arg2, %arg1 : i32, i32
  }
  func.func @transform_2(%arg0: i32, %arg1: i32, %arg2: i32) -> (i32, i32) {
    %c0_i32 = arith.constant 0 : i32
    %c0_i32_0 = arith.constant 0 : i32
    return %c0_i32, %arg1 : i32, i32
  }
  func.func @transform_3(%arg0: i32, %arg1: i32, %arg2: i32) -> (i32, i32) {
    %c0_i32 = arith.constant 0 : i32
    %c0_i32_0 = arith.constant 0 : i32
    return %c0_i32, %arg1 : i32, i32
  }
  func.func @transform_4(%arg0: i32, %arg1: i32, %arg2: i32) -> (i32, i32) {
    %c0_i32 = arith.constant 0 : i32
    return %arg0, %arg1 : i32, i32
  }
  func.func @transform_5(%arg0: i32, %arg1: i32, %arg2: i32) -> (i32, i32) {
    %c0_i32 = arith.constant 0 : i32
    return %arg0, %arg1 : i32, i32
  }
}

</mosaic_0001>

<bundles_post_ra>
// kernel: resnet_block_forward.3
= control target key start
LH: loop header
LB: loop body
LE: loop exit
PB: predicated region body
PF: predicated region fallthrough
CT: control target
= control target key end

     0   :  { %s774_s1 = inlined_call_operand.vmem [shape: bf16[128,128], index: 1, kind: input, shape index: {}]   ;;  %s775_s0 = inlined_call_operand.vmem [shape: bf16[128,128], index: 0, kind: input, shape index: {}]   ;;  %s776_s2 = inlined_call_operand.vmem [shape: f32[1,128], index: 2, kind: input, shape index: {}]   ;;  %s777_s3 = inlined_call_operand.vmem [shape: f32[1,128], index: 3, kind: input, shape index: {}]   ;;  %s778_s4 = inlined_call_operand.vmem [shape: bf16[128,128], index: 4, kind: output, shape index: {}]  }
   0x1   :  { %v637_v0 = vld [vmem:[%s774_s1 + $0x38] sm:$0xff]   ;;  %v638_v1 = vld [vmem:[%s774_s1 + $0x30] sm:$0xff]   ;;  %v639_v2 = vld [vmem:[%s774_s1 + $0x28] sm:$0xff]  }
   0x2   :  { %589 = vmatprep.subr.bf16.mxu0 %v637_v0  ;;  %621 = vmatprep.subr.bf16.mxu1 %v637_v0  ;;  %v640_v3 = vld [vmem:[%s774_s1 + $0x20] sm:$0xff]   ;;  %v641_v6 = vld [vmem:[%s774_s1 + $0x18] sm:$0xff]   ;;  %v642_v7 = vld [vmem:[%s774_s1 + $0x10] sm:$0xff]  }
   0x3   :  { %590 = vmatpush3.bf16.msra.mxu0 %v637_v0  ;;  %629 = vmatpush3.bf16.msra.mxu1 %v637_v0  ;;  %v645_v4 = vld [vmem:[%s775_s0] sm:$0xff]   ;;  %v643_v8 = vld [vmem:[%s774_s1 + $0x8] sm:$0xff]   ;;  %v649_v12 = vld [vmem:[%s775_s0 + $0x10] sm:$0xff]  }
   0x4   :  { %591 = vmatprep.subr.bf16.mxu0 %v638_v1  ;;  %622 = vmatprep.subr.bf16.mxu1 %v638_v1  ;;  %v646_v5 = vld [vmem:[%s775_s0 + $0x20] sm:$0xff]   ;;  %v647_v10 = vld [vmem:[%s775_s0 + $0x8] sm:$0xff]   ;;  %v650_v13 = vld [vmem:[%s775_s0 + $0x30] sm:$0xff]  }
   0x5   :  { %605 = vmatprep.mubr.bf16.mxu0 %v645_v4  ;;  %613 = vmatprep.mubr.bf16.mxu1 %v646_v5  ;;  %v644_v9 = vld [vmem:[%s774_s1] sm:$0xff]   ;;  %v648_v11 = vld [vmem:[%s775_s0 + $0x28] sm:$0xff]   ;;  %v651_v14 = vld [vmem:[%s775_s0 + $0x18] sm:$0xff]  }
   0x6   :  { %v652_v15 = vld [vmem:[%s775_s0 + $0x38] sm:$0xff]   ;;  %v729_v16 = vld [vmem:[%s776_s2] ss:$0 sm:$0xff] }
   0x7   :  { %592 = vmatpush3.bf16.msra.mxu0 %v638_v1  ;;  %630 = vmatpush3.bf16.msra.mxu1 %v638_v1  ;;  %v493_v21 = vld [vmem:[%s777_s3] ss:$0 sm:$0xff] }
   0x8   :  { %593 = vmatprep.subr.bf16.mxu0 %v639_v2  ;;  %623 = vmatprep.subr.bf16.mxu1 %v639_v2 }
   0xb   :  { %594 = vmatpush3.bf16.msra.mxu0 %v639_v2  ;;  %631 = vmatpush3.bf16.msra.mxu1 %v639_v2 }
   0xc   :  { %595 = vmatprep.subr.bf16.mxu0 %v640_v3  ;;  %624 = vmatprep.subr.bf16.mxu1 %v640_v3 }
   0xf   :  { %596 = vmatpush3.bf16.msra.mxu0 %v640_v3  ;;  %632 = vmatpush3.bf16.msra.mxu1 %v640_v3 }
  0x10   :  { %597 = vmatprep.subr.bf16.mxu0 %v641_v6  ;;  %625 = vmatprep.subr.bf16.mxu1 %v641_v6 }
  0x13   :  { %598 = vmatpush3.bf16.msra.mxu0 %v641_v6  ;;  %633 = vmatpush3.bf16.msra.mxu1 %v641_v6 }
  0x14   :  { %599 = vmatprep.subr.bf16.mxu0 %v642_v7  ;;  %626 = vmatprep.subr.bf16.mxu1 %v642_v7 }
  0x17   :  { %600 = vmatpush3.bf16.msra.mxu0 %v642_v7  ;;  %634 = vmatpush3.bf16.msra.mxu1 %v642_v7 }
  0x18   :  { %601 = vmatprep.subr.bf16.mxu0 %v643_v8  ;;  %627 = vmatprep.subr.bf16.mxu1 %v643_v8 }
  0x1b   :  { %602 = vmatpush3.bf16.msra.mxu0 %v643_v8  ;;  %635 = vmatpush3.bf16.msra.mxu1 %v643_v8 }
  0x1c   :  { %603 = vmatprep.subr.bf16.mxu0 %v644_v9  ;;  %628 = vmatprep.subr.bf16.mxu1 %v644_v9 }
  0x1f   :  { %604 = vmatpush3.bf16.msra.mxu0 %v644_v9  ;;  %636 = vmatpush3.bf16.msra.mxu1 %v644_v9 }
  0x22   :  { %606 = vmatmul.mubr.bf16.vlgmr.msra.gmra.mxu0 %v647_v10  ;;  %614 = vmatmul.mubr.bf16.vlgmr.msra.gmra.mxu1 %v648_v11 }
  0x23   :  { %609 = vmatprep.mubr.bf16.mxu0 %v649_v12  ;;  %617 = vmatprep.mubr.bf16.mxu1 %v650_v13 }
  0x2a   :  { %610 = vmatmul.mubr.bf16.gmra.mxu0 %v651_v14  ;;  %618 = vmatmul.mubr.bf16.gmra.mxu1 %v652_v15 }
  0xe2   :  { %v607_v17 = vpop.f32.mrf.mxu0  ;;  %v615_v18 = vpop.f32.mrf.mxu1 }
  0xe3   :  { %v339_v19 = vmul.f32 %v607_v17, %v729_v16  ;;  %v347_v20 = vmul.f32 %v615_v18, %v729_v16 }
  0xe4   :  { %v216_v22 = vpop.f32.mrf.mxu0  ;;  %v248_v23 = vpop.f32.mrf.mxu1 }
  0xe5   :  { %v337_v24 = vmul.f32 %v729_v16, %v216_v22  ;;  %v345_v25 = vmul.f32 %v729_v16, %v248_v23  ;;  %v362_v28 = vadd.f32 %v493_v21, %v339_v19  ;;  %v370_v29 = vadd.f32 %v493_v21, %v347_v20 }
  0xe6   :  { %v608_v26 = vpop.f32.mrf.mxu0  ;;  %v616_v27 = vpop.f32.mrf.mxu1 }
  0xe7   :  { %v340_v30 = vmul.f32 %v608_v26, %v729_v16  ;;  %v348_v31 = vmul.f32 %v616_v27, %v729_v16  ;;  %v360_v34 = vadd.f32 %v493_v21, %v337_v24  ;;  %v368_v35 = vadd.f32 %v493_v21, %v345_v25 }
  0xe8   :  { %v219_v32 = vpop.f32.mrf.mxu0  ;;  %v251_v33 = vpop.f32.mrf.mxu1  ;;  %v378_v42 = vmax.f32 %v362_v28, 0.0  ;;  %v386_v43 = vmax.f32 %v370_v29, 0.0 }
  0xe9   :  { %v338_v36 = vmul.f32 %v729_v16, %v219_v32  ;;  %v346_v37 = vmul.f32 %v729_v16, %v251_v33  ;;  %v363_v38 = vadd.f32 %v493_v21, %v340_v30  ;;  %v371_v39 = vadd.f32 %v493_v21, %v348_v31 }
  0xea   :  { %v611_v40 = vpop.f32.mrf.mxu0  ;;  %v619_v41 = vpop.f32.mrf.mxu1  ;;  %v376_v52 = vmax.f32 %v360_v34, 0.0  ;;  %v384_v53 = vmax.f32 %v368_v35, 0.0 }
  0xeb   :  { %v361_v44 = vadd.f32 %v493_v21, %v338_v36  ;;  %v369_v45 = vadd.f32 %v493_v21, %v346_v37  ;;  %v379_v46 = vmax.f32 %v363_v38, 0.0  ;;  %v387_v47 = vmax.f32 %v371_v39, 0.0 }
  0xec   :  { %v343_v48 = vmul.f32 %v611_v40, %v729_v16  ;;  %v351_v49 = vmul.f32 %v619_v41, %v729_v16  ;;  %v232_v50 = vpop.f32.mrf.mxu0  ;;  %v264_v51 = vpop.f32.mrf.mxu1 }
  0xed   :  { %v377_v54 = vmax.f32 %v361_v44, 0.0  ;;  %v385_v55 = vmax.f32 %v369_v45, 0.0  ;;  %v534_v56 = vpack.c.bf16 %v379_v46, %v378_v42  ;;  %v554_v57 = vpack.c.bf16 %v387_v47, %v386_v43 }
  0xee   :  { %v341_v58 = vmul.f32 %v729_v16, %v232_v50  ;;  %v349_v59 = vmul.f32 %v729_v16, %v264_v51  ;;  %v612_v60 = vpop.f32.mrf.mxu0  ;;  %v620_v61 = vpop.f32.mrf.mxu1  ;;  %v366_v0 = vadd.f32 %v493_v21, %v343_v48  ;;  %v374_v1 = vadd.f32 %v493_v21, %v351_v49 }
  0xef   :  { %v529_v62 = vpack.c.bf16 %v377_v54, %v376_v52  ;;  %v549_v63 = vpack.c.bf16 %v385_v55, %v384_v53  ;;  %566 = vst [vmem:[%s778_s4 + $0x8] sm:$0xff] %v534_v56   ;;  %570 = vst [vmem:[%s778_s4 + $0x28] sm:$0xff] %v554_v57   ;;  %v344_v2 = vmul.f32 %v612_v60, %v729_v16 }
  0xf0   :  { %v352_v3 = vmul.f32 %v620_v61, %v729_v16  ;;  %v235_v4 = vpop.f32.mrf.mxu0  ;;  %v267_v5 = vpop.f32.mrf.mxu1  ;;  %v364_v6 = vadd.f32 %v493_v21, %v341_v58  ;;  %v372_v7 = vadd.f32 %v493_v21, %v349_v59  ;;  %v382_v14 = vmax.f32 %v366_v0, 0.0 }
  0xf1   :  { %530 = vst [vmem:[%s778_s4] sm:$0xff] %v529_v62   ;;  %569 = vst [vmem:[%s778_s4 + $0x20] sm:$0xff] %v549_v63   ;;  %v342_v8 = vmul.f32 %v729_v16, %v235_v4  ;;  %v350_v9 = vmul.f32 %v729_v16, %v267_v5  ;;  %v367_v10 = vadd.f32 %v493_v21, %v344_v2  ;;  %v390_v15 = vmax.f32 %v374_v1, 0.0 }
  0xf2   :  { %v375_v11 = vadd.f32 %v493_v21, %v352_v3  ;;  %v380_v19 = vmax.f32 %v364_v6, 0.0  ;;  %v388_v20 = vmax.f32 %v372_v7, 0.0 }
  0xf3   :  { %v365_v12 = vadd.f32 %v493_v21, %v342_v8  ;;  %v373_v13 = vadd.f32 %v493_v21, %v350_v9  ;;  %v383_v17 = vmax.f32 %v367_v10, 0.0 }
  0xf4   :  { %v391_v18 = vmax.f32 %v375_v11, 0.0 }
  0xf5   :  { %v381_v22 = vmax.f32 %v365_v12, 0.0  ;;  %v389_v23 = vmax.f32 %v373_v13, 0.0  ;;  %v544_v24 = vpack.c.bf16 %v383_v17, %v382_v14 }
  0xf6   :  { %v564_v25 = vpack.c.bf16 %v391_v18, %v390_v15 }
  0xf7   :  { %v539_v26 = vpack.c.bf16 %v381_v22, %v380_v19  ;;  %v559_v27 = vpack.c.bf16 %v389_v23, %v388_v20  ;;  %568 = vst [vmem:[%s778_s4 + $0x18] sm:$0xff] %v544_v24  }
  0xf8   :  { %572 = vst [vmem:[%s778_s4 + $0x38] sm:$0xff] %v564_v25  }
  0xf9   :  { %567 = vst [vmem:[%s778_s4 + $0x10] sm:$0xff] %v539_v26   ;;  %571 = vst [vmem:[%s778_s4 + $0x30] sm:$0xff] %v559_v27  }

// kernel: resnet_block_forward.4
= control target key start
LH: loop header
LB: loop body
LE: loop exit
PB: predicated region body
PF: predicated region fallthrough
CT: control target
= control target key end

     0   :  { %s621_s1 = inlined_call_operand.vmem [shape: bf16[128,128], index: 1, kind: input, shape index: {}]   ;;  %s622_s0 = inlined_call_operand.vmem [shape: bf16[128,128], index: 0, kind: input, shape index: {}]   ;;  %s623_s2 = inlined_call_operand.vmem [shape: f32[1,128], index: 2, kind: input, shape index: {}]   ;;  %s624_s3 = inlined_call_operand.vmem [shape: f32[1,128], index: 3, kind: input, shape index: {}]   ;;  %s625_s4 = inlined_call_operand.vmem [shape: f32[128,128], index: 4, kind: output, shape index: {}]  }
   0x1   :  { %v478_v0 = vld [vmem:[%s621_s1 + $0x38] sm:$0xff]   ;;  %v479_v1 = vld [vmem:[%s621_s1 + $0x30] sm:$0xff]   ;;  %v480_v2 = vld [vmem:[%s621_s1 + $0x28] sm:$0xff]  }
   0x2   :  { %430 = vmatprep.subr.bf16.mxu0 %v478_v0  ;;  %462 = vmatprep.subr.bf16.mxu1 %v478_v0  ;;  %v481_v3 = vld [vmem:[%s621_s1 + $0x20] sm:$0xff]   ;;  %v482_v6 = vld [vmem:[%s621_s1 + $0x18] sm:$0xff]   ;;  %v483_v7 = vld [vmem:[%s621_s1 + $0x10] sm:$0xff]  }
   0x3   :  { %431 = vmatpush3.bf16.msra.mxu0 %v478_v0  ;;  %470 = vmatpush3.bf16.msra.mxu1 %v478_v0  ;;  %v486_v4 = vld [vmem:[%s622_s0] sm:$0xff]   ;;  %v484_v8 = vld [vmem:[%s621_s1 + $0x8] sm:$0xff]   ;;  %v490_v12 = vld [vmem:[%s622_s0 + $0x10] sm:$0xff]  }
   0x4   :  { %432 = vmatprep.subr.bf16.mxu0 %v479_v1  ;;  %463 = vmatprep.subr.bf16.mxu1 %v479_v1  ;;  %v487_v5 = vld [vmem:[%s622_s0 + $0x20] sm:$0xff]   ;;  %v488_v10 = vld [vmem:[%s622_s0 + $0x8] sm:$0xff]   ;;  %v491_v13 = vld [vmem:[%s622_s0 + $0x30] sm:$0xff]  }
   0x5   :  { %446 = vmatprep.mubr.bf16.mxu0 %v486_v4  ;;  %454 = vmatprep.mubr.bf16.mxu1 %v487_v5  ;;  %v485_v9 = vld [vmem:[%s621_s1] sm:$0xff]   ;;  %v489_v11 = vld [vmem:[%s622_s0 + $0x28] sm:$0xff]   ;;  %v492_v14 = vld [vmem:[%s622_s0 + $0x18] sm:$0xff]  }
   0x6   :  { %v493_v15 = vld [vmem:[%s622_s0 + $0x38] sm:$0xff]   ;;  %v412_v16 = vld [vmem:[%s623_s2] ss:$0 sm:$0xff] }
   0x7   :  { %433 = vmatpush3.bf16.msra.mxu0 %v479_v1  ;;  %471 = vmatpush3.bf16.msra.mxu1 %v479_v1  ;;  %v413_v18 = vld [vmem:[%s624_s3] ss:$0 sm:$0xff] }
   0x8   :  { %434 = vmatprep.subr.bf16.mxu0 %v480_v2  ;;  %464 = vmatprep.subr.bf16.mxu1 %v480_v2 }
   0xb   :  { %435 = vmatpush3.bf16.msra.mxu0 %v480_v2  ;;  %472 = vmatpush3.bf16.msra.mxu1 %v480_v2 }
   0xc   :  { %436 = vmatprep.subr.bf16.mxu0 %v481_v3  ;;  %465 = vmatprep.subr.bf16.mxu1 %v481_v3 }
   0xf   :  { %437 = vmatpush3.bf16.msra.mxu0 %v481_v3  ;;  %473 = vmatpush3.bf16.msra.mxu1 %v481_v3 }
  0x10   :  { %438 = vmatprep.subr.bf16.mxu0 %v482_v6  ;;  %466 = vmatprep.subr.bf16.mxu1 %v482_v6 }
  0x13   :  { %439 = vmatpush3.bf16.msra.mxu0 %v482_v6  ;;  %474 = vmatpush3.bf16.msra.mxu1 %v482_v6 }
  0x14   :  { %440 = vmatprep.subr.bf16.mxu0 %v483_v7  ;;  %467 = vmatprep.subr.bf16.mxu1 %v483_v7 }
  0x17   :  { %441 = vmatpush3.bf16.msra.mxu0 %v483_v7  ;;  %475 = vmatpush3.bf16.msra.mxu1 %v483_v7 }
  0x18   :  { %442 = vmatprep.subr.bf16.mxu0 %v484_v8  ;;  %468 = vmatprep.subr.bf16.mxu1 %v484_v8 }
  0x1b   :  { %443 = vmatpush3.bf16.msra.mxu0 %v484_v8  ;;  %476 = vmatpush3.bf16.msra.mxu1 %v484_v8 }
  0x1c   :  { %444 = vmatprep.subr.bf16.mxu0 %v485_v9  ;;  %469 = vmatprep.subr.bf16.mxu1 %v485_v9 }
  0x1f   :  { %445 = vmatpush3.bf16.msra.mxu0 %v485_v9  ;;  %477 = vmatpush3.bf16.msra.mxu1 %v485_v9 }
  0x22   :  { %447 = vmatmul.mubr.bf16.vlgmr.msra.gmra.mxu0 %v488_v10  ;;  %455 = vmatmul.mubr.bf16.vlgmr.msra.gmra.mxu1 %v489_v11 }
  0x23   :  { %450 = vmatprep.mubr.bf16.mxu0 %v490_v12  ;;  %458 = vmatprep.mubr.bf16.mxu1 %v491_v13 }
  0x2a   :  { %451 = vmatmul.mubr.bf16.gmra.mxu0 %v492_v14  ;;  %459 = vmatmul.mubr.bf16.gmra.mxu1 %v493_v15 }
  0xe2   :  { %v448_v17 = vpop.f32.mrf.mxu0  ;;  %v456_v19 = vpop.f32.mrf.mxu1 }
  0xe3   :  { %v339_v20 = vmul.f32 %v448_v17, %v412_v16  ;;  %v347_v21 = vmul.f32 %v456_v19, %v412_v16 }
  0xe4   :  { %v216_v22 = vpop.f32.mrf.mxu0  ;;  %v248_v23 = vpop.f32.mrf.mxu1 }
  0xe5   :  { %v362_v24 = vadd.f32 %v413_v18, %v339_v20  ;;  %v370_v25 = vadd.f32 %v413_v18, %v347_v21  ;;  %v337_v26 = vmul.f32 %v412_v16, %v216_v22  ;;  %v345_v27 = vmul.f32 %v412_v16, %v248_v23 }
  0xe6   :  { %v449_v28 = vpop.f32.mrf.mxu0  ;;  %v457_v29 = vpop.f32.mrf.mxu1 }
  0xe7   :  { %378 = vst [vmem:[%s625_s4 + $0x10] sm:$0xff] %v362_v24  ;;  %386 = vst [vmem:[%s625_s4 + $0x50] sm:$0xff] %v370_v25  ;;  %v360_v30 = vadd.f32 %v413_v18, %v337_v26  ;;  %v368_v31 = vadd.f32 %v413_v18, %v345_v27  ;;  %v340_v32 = vmul.f32 %v449_v28, %v412_v16 }
  0xe8   :  { %v348_v33 = vmul.f32 %v457_v29, %v412_v16  ;;  %v219_v34 = vpop.f32.mrf.mxu0  ;;  %v251_v35 = vpop.f32.mrf.mxu1 }
  0xe9   :  { %376 = vst [vmem:[%s625_s4] sm:$0xff] %v360_v30  ;;  %384 = vst [vmem:[%s625_s4 + $0x40] sm:$0xff] %v368_v31  ;;  %v363_v36 = vadd.f32 %v413_v18, %v340_v32  ;;  %v338_v38 = vmul.f32 %v412_v16, %v219_v34  ;;  %v346_v39 = vmul.f32 %v412_v16, %v251_v35 }
  0xea   :  { %v371_v37 = vadd.f32 %v413_v18, %v348_v33  ;;  %v452_v40 = vpop.f32.mrf.mxu0  ;;  %v460_v41 = vpop.f32.mrf.mxu1 }
  0xeb   :  { %379 = vst [vmem:[%s625_s4 + $0x18] sm:$0xff] %v363_v36  ;;  %v361_v42 = vadd.f32 %v413_v18, %v338_v38  ;;  %v369_v43 = vadd.f32 %v413_v18, %v346_v39  ;;  %v343_v44 = vmul.f32 %v452_v40, %v412_v16  ;;  %v351_v45 = vmul.f32 %v460_v41, %v412_v16 }
  0xec   :  { %387 = vst [vmem:[%s625_s4 + $0x58] sm:$0xff] %v371_v37  ;;  %v232_v46 = vpop.f32.mrf.mxu0  ;;  %v264_v47 = vpop.f32.mrf.mxu1 }
  0xed   :  { %377 = vst [vmem:[%s625_s4 + $0x8] sm:$0xff] %v361_v42  ;;  %385 = vst [vmem:[%s625_s4 + $0x48] sm:$0xff] %v369_v43  ;;  %v366_v48 = vadd.f32 %v413_v18, %v343_v44  ;;  %v374_v49 = vadd.f32 %v413_v18, %v351_v45  ;;  %v341_v50 = vmul.f32 %v412_v16, %v232_v46 }
  0xee   :  { %v349_v51 = vmul.f32 %v412_v16, %v264_v47  ;;  %v453_v52 = vpop.f32.mrf.mxu0  ;;  %v461_v53 = vpop.f32.mrf.mxu1 }
  0xef   :  { %382 = vst [vmem:[%s625_s4 + $0x30] sm:$0xff] %v366_v48  ;;  %390 = vst [vmem:[%s625_s4 + $0x70] sm:$0xff] %v374_v49  ;;  %v364_v54 = vadd.f32 %v413_v18, %v341_v50  ;;  %v344_v56 = vmul.f32 %v453_v52, %v412_v16  ;;  %v352_v57 = vmul.f32 %v461_v53, %v412_v16 }
  0xf0   :  { %v372_v55 = vadd.f32 %v413_v18, %v349_v51  ;;  %v235_v58 = vpop.f32.mrf.mxu0  ;;  %v267_v59 = vpop.f32.mrf.mxu1 }
  0xf1   :  { %380 = vst [vmem:[%s625_s4 + $0x20] sm:$0xff] %v364_v54  ;;  %v367_v60 = vadd.f32 %v413_v18, %v344_v56  ;;  %v375_v61 = vadd.f32 %v413_v18, %v352_v57  ;;  %v342_v62 = vmul.f32 %v412_v16, %v235_v58  ;;  %v350_v63 = vmul.f32 %v412_v16, %v267_v59 }
  0xf2   :  { %388 = vst [vmem:[%s625_s4 + $0x60] sm:$0xff] %v372_v55 }
  0xf3   :  { %383 = vst [vmem:[%s625_s4 + $0x38] sm:$0xff] %v367_v60  ;;  %391 = vst [vmem:[%s625_s4 + $0x78] sm:$0xff] %v375_v61  ;;  %v365_v0 = vadd.f32 %v413_v18, %v342_v62  ;;  %v373_v1 = vadd.f32 %v413_v18, %v350_v63 }
  0xf5   :  { %381 = vst [vmem:[%s625_s4 + $0x28] sm:$0xff] %v365_v0  ;;  %389 = vst [vmem:[%s625_s4 + $0x68] sm:$0xff] %v373_v1 }

// kernel: resnet_block_forward.5
= control target key start
LH: loop header
LB: loop body
LE: loop exit
PB: predicated region body
PF: predicated region fallthrough
CT: control target
= control target key end

     0   :  { %s761_s1 = inlined_call_operand.vmem [shape: bf16[128,128], index: 1, kind: input, shape index: {}]   ;;  %s762_s0 = inlined_call_operand.vmem [shape: bf16[128,128], index: 0, kind: input, shape index: {}]   ;;  %s763_s2 = inlined_call_operand.vmem [shape: f32[1,128], index: 2, kind: input, shape index: {}]   ;;  %s764_s3 = inlined_call_operand.vmem [shape: f32[1,128], index: 3, kind: input, shape index: {}]   ;;  %s765_s4 = inlined_call_operand.vmem [shape: f32[128,128], index: 4, kind: input, shape index: {}]   ;;  %s766_s5 = inlined_call_operand.vmem [shape: f32[128,128], index: 5, kind: output, shape index: {}]  }
   0x1   :  { %v529_v0 = vld [vmem:[%s761_s1 + $0x38] sm:$0xff]   ;;  %v530_v1 = vld [vmem:[%s761_s1 + $0x30] sm:$0xff]   ;;  %v531_v2 = vld [vmem:[%s761_s1 + $0x28] sm:$0xff]  }
   0x2   :  { %481 = vmatprep.subr.bf16.mxu0 %v529_v0  ;;  %513 = vmatprep.subr.bf16.mxu1 %v529_v0  ;;  %v532_v3 = vld [vmem:[%s761_s1 + $0x20] sm:$0xff]   ;;  %v533_v6 = vld [vmem:[%s761_s1 + $0x18] sm:$0xff]   ;;  %v534_v7 = vld [vmem:[%s761_s1 + $0x10] sm:$0xff]  }
   0x3   :  { %482 = vmatpush3.bf16.msra.mxu0 %v529_v0  ;;  %521 = vmatpush3.bf16.msra.mxu1 %v529_v0  ;;  %v537_v4 = vld [vmem:[%s762_s0] sm:$0xff]   ;;  %v535_v8 = vld [vmem:[%s761_s1 + $0x8] sm:$0xff]   ;;  %v541_v12 = vld [vmem:[%s762_s0 + $0x10] sm:$0xff]  }
   0x4   :  { %483 = vmatprep.subr.bf16.mxu0 %v530_v1  ;;  %514 = vmatprep.subr.bf16.mxu1 %v530_v1  ;;  %v538_v5 = vld [vmem:[%s762_s0 + $0x20] sm:$0xff]   ;;  %v539_v10 = vld [vmem:[%s762_s0 + $0x8] sm:$0xff]   ;;  %v542_v13 = vld [vmem:[%s762_s0 + $0x30] sm:$0xff]  }
   0x5   :  { %497 = vmatprep.mubr.bf16.mxu0 %v537_v4  ;;  %505 = vmatprep.mubr.bf16.mxu1 %v538_v5  ;;  %v536_v9 = vld [vmem:[%s761_s1] sm:$0xff]   ;;  %v540_v11 = vld [vmem:[%s762_s0 + $0x28] sm:$0xff]   ;;  %v543_v14 = vld [vmem:[%s762_s0 + $0x18] sm:$0xff]  }
   0x6   :  { %v544_v15 = vld [vmem:[%s762_s0 + $0x38] sm:$0xff]   ;;  %v626_v16 = vld [vmem:[%s763_s2] ss:$0 sm:$0xff]  ;;  %v381_v22 = vld [vmem:[%s765_s4 + $0x10] sm:$0xff] }
   0x7   :  { %484 = vmatpush3.bf16.msra.mxu0 %v530_v1  ;;  %522 = vmatpush3.bf16.msra.mxu1 %v530_v1  ;;  %v631_v18 = vld [vmem:[%s764_s3] ss:$0 sm:$0xff]  ;;  %v389_v23 = vld [vmem:[%s765_s4 + $0x50] sm:$0xff]  ;;  %v382_v46 = vld [vmem:[%s765_s4 + $0x18] sm:$0xff] }
   0x8   :  { %485 = vmatprep.subr.bf16.mxu0 %v531_v2  ;;  %515 = vmatprep.subr.bf16.mxu1 %v531_v2  ;;  %v379_v30 = vld [vmem:[%s765_s4] sm:$0xff]  ;;  %v390_v47 = vld [vmem:[%s765_s4 + $0x58] sm:$0xff]  ;;  %v380_v56 = vld [vmem:[%s765_s4 + $0x8] sm:$0xff] }
   0x9   :  { %v387_v31 = vld [vmem:[%s765_s4 + $0x40] sm:$0xff]  ;;  %v388_v57 = vld [vmem:[%s765_s4 + $0x48] sm:$0xff]  ;;  %v385_v0 = vld [vmem:[%s765_s4 + $0x30] sm:$0xff] }
   0xa   :  { %v393_v1 = vld [vmem:[%s765_s4 + $0x70] sm:$0xff] }
   0xb   :  { %486 = vmatpush3.bf16.msra.mxu0 %v531_v2  ;;  %523 = vmatpush3.bf16.msra.mxu1 %v531_v2 }
   0xc   :  { %487 = vmatprep.subr.bf16.mxu0 %v532_v3  ;;  %516 = vmatprep.subr.bf16.mxu1 %v532_v3 }
   0xf   :  { %488 = vmatpush3.bf16.msra.mxu0 %v532_v3  ;;  %524 = vmatpush3.bf16.msra.mxu1 %v532_v3 }
  0x10   :  { %489 = vmatprep.subr.bf16.mxu0 %v533_v6  ;;  %517 = vmatprep.subr.bf16.mxu1 %v533_v6 }
  0x13   :  { %490 = vmatpush3.bf16.msra.mxu0 %v533_v6  ;;  %525 = vmatpush3.bf16.msra.mxu1 %v533_v6 }
  0x14   :  { %491 = vmatprep.subr.bf16.mxu0 %v534_v7  ;;  %518 = vmatprep.subr.bf16.mxu1 %v534_v7 }
  0x17   :  { %492 = vmatpush3.bf16.msra.mxu0 %v534_v7  ;;  %526 = vmatpush3.bf16.msra.mxu1 %v534_v7 }
  0x18   :  { %493 = vmatprep.subr.bf16.mxu0 %v535_v8  ;;  %519 = vmatprep.subr.bf16.mxu1 %v535_v8 }
  0x1b   :  { %494 = vmatpush3.bf16.msra.mxu0 %v535_v8  ;;  %527 = vmatpush3.bf16.msra.mxu1 %v535_v8 }
  0x1c   :  { %495 = vmatprep.subr.bf16.mxu0 %v536_v9  ;;  %520 = vmatprep.subr.bf16.mxu1 %v536_v9 }
  0x1f   :  { %496 = vmatpush3.bf16.msra.mxu0 %v536_v9  ;;  %528 = vmatpush3.bf16.msra.mxu1 %v536_v9 }
  0x22   :  { %498 = vmatmul.mubr.bf16.vlgmr.msra.gmra.mxu0 %v539_v10  ;;  %506 = vmatmul.mubr.bf16.vlgmr.msra.gmra.mxu1 %v540_v11 }
  0x23   :  { %501 = vmatprep.mubr.bf16.mxu0 %v541_v12  ;;  %509 = vmatprep.mubr.bf16.mxu1 %v542_v13  ;;  %v383_v12 = vld [vmem:[%s765_s4 + $0x20] sm:$0xff] }
  0x24   :  { %v391_v13 = vld [vmem:[%s765_s4 + $0x60] sm:$0xff] }
  0x2a   :  { %502 = vmatmul.mubr.bf16.gmra.mxu0 %v543_v14  ;;  %510 = vmatmul.mubr.bf16.gmra.mxu1 %v544_v15 }
  0xe2   :  { %v499_v17 = vpop.f32.mrf.mxu0  ;;  %v507_v19 = vpop.f32.mrf.mxu1 }
  0xe3   :  { %v342_v20 = vmul.f32 %v499_v17, %v626_v16  ;;  %v350_v21 = vmul.f32 %v507_v19, %v626_v16 }
  0xe4   :  { %v219_v24 = vpop.f32.mrf.mxu0  ;;  %v251_v25 = vpop.f32.mrf.mxu1 }
  0xe5   :  { %v365_v26 = vadd.f32 %v631_v18, %v342_v20  ;;  %v373_v27 = vadd.f32 %v631_v18, %v350_v21  ;;  %v340_v28 = vmul.f32 %v626_v16, %v219_v24  ;;  %v348_v29 = vmul.f32 %v626_v16, %v251_v25 }
  0xe6   :  { %v500_v32 = vpop.f32.mrf.mxu0  ;;  %v508_v33 = vpop.f32.mrf.mxu1 }
  0xe7   :  { %v397_v34 = vadd.f32 %v381_v22, %v365_v26  ;;  %v405_v35 = vadd.f32 %v389_v23, %v373_v27  ;;  %v363_v36 = vadd.f32 %v631_v18, %v340_v28  ;;  %v371_v37 = vadd.f32 %v631_v18, %v348_v29 }
  0xe8   :  { %v343_v38 = vmul.f32 %v500_v32, %v626_v16  ;;  %v351_v39 = vmul.f32 %v508_v33, %v626_v16  ;;  %v222_v40 = vpop.f32.mrf.mxu0  ;;  %v254_v41 = vpop.f32.mrf.mxu1  ;;  %v386_v32 = vld [vmem:[%s765_s4 + $0x38] sm:$0xff] }
  0xe9   :  { %v413_v42 = vmax.f32 %v397_v34, 0.0  ;;  %v421_v43 = vmax.f32 %v405_v35, 0.0  ;;  %v395_v44 = vadd.f32 %v379_v30, %v363_v36  ;;  %v403_v45 = vadd.f32 %v387_v31, %v371_v37  ;;  %v394_v33 = vld [vmem:[%s765_s4 + $0x78] sm:$0xff] }
  0xea   :  { %v366_v48 = vadd.f32 %v631_v18, %v343_v38  ;;  %v374_v49 = vadd.f32 %v631_v18, %v351_v39  ;;  %v341_v50 = vmul.f32 %v626_v16, %v222_v40  ;;  %v349_v51 = vmul.f32 %v626_v16, %v254_v41  ;;  %v503_v52 = vpop.f32.mrf.mxu0  ;;  %v511_v53 = vpop.f32.mrf.mxu1  ;;  %v384_v40 = vld [vmem:[%s765_s4 + $0x28] sm:$0xff] }
  0xeb   :  { %429 = vst [vmem:[%s766_s5 + $0x10] sm:$0xff] %v413_v42  ;;  %437 = vst [vmem:[%s766_s5 + $0x50] sm:$0xff] %v421_v43  ;;  %v411_v54 = vmax.f32 %v395_v44, 0.0  ;;  %v419_v55 = vmax.f32 %v403_v45, 0.0  ;;  %v346_v58 = vmul.f32 %v503_v52, %v626_v16  ;;  %v354_v59 = vmul.f32 %v511_v53, %v626_v16  ;;  %v392_v41 = vld [vmem:[%s765_s4 + $0x68] sm:$0xff] }
  0xec   :  { %v398_v60 = vadd.f32 %v382_v46, %v366_v48  ;;  %v406_v61 = vadd.f32 %v390_v47, %v374_v49  ;;  %v364_v62 = vadd.f32 %v631_v18, %v341_v50  ;;  %v372_v63 = vadd.f32 %v631_v18, %v349_v51  ;;  %v235_v2 = vpop.f32.mrf.mxu0  ;;  %v267_v3 = vpop.f32.mrf.mxu1 }
  0xed   :  { %427 = vst [vmem:[%s766_s5] sm:$0xff] %v411_v54  ;;  %435 = vst [vmem:[%s766_s5 + $0x40] sm:$0xff] %v419_v55  ;;  %v369_v4 = vadd.f32 %v631_v18, %v346_v58  ;;  %v377_v5 = vadd.f32 %v631_v18, %v354_v59  ;;  %v344_v6 = vmul.f32 %v626_v16, %v235_v2 }
  0xee   :  { %v352_v7 = vmul.f32 %v626_v16, %v267_v3  ;;  %v414_v8 = vmax.f32 %v398_v60, 0.0  ;;  %v422_v9 = vmax.f32 %v406_v61, 0.0  ;;  %v396_v10 = vadd.f32 %v380_v56, %v364_v62  ;;  %v504_v14 = vpop.f32.mrf.mxu0  ;;  %v512_v15 = vpop.f32.mrf.mxu1 }
  0xef   :  { %v404_v11 = vadd.f32 %v388_v57, %v372_v63  ;;  %v401_v17 = vadd.f32 %v385_v0, %v369_v4  ;;  %v409_v19 = vadd.f32 %v393_v1, %v377_v5  ;;  %v367_v20 = vadd.f32 %v631_v18, %v344_v6 }
  0xf0   :  { %v375_v21 = vadd.f32 %v631_v18, %v352_v7  ;;  %430 = vst [vmem:[%s766_s5 + $0x18] sm:$0xff] %v414_v8  ;;  %438 = vst [vmem:[%s766_s5 + $0x58] sm:$0xff] %v422_v9  ;;  %v412_v22 = vmax.f32 %v396_v10, 0.0  ;;  %v347_v24 = vmul.f32 %v504_v14, %v626_v16  ;;  %v355_v25 = vmul.f32 %v512_v15, %v626_v16  ;;  %v238_v26 = vpop.f32.mrf.mxu0  ;;  %v270_v27 = vpop.f32.mrf.mxu1 }
  0xf1   :  { %v420_v23 = vmax.f32 %v404_v11, 0.0  ;;  %v417_v28 = vmax.f32 %v401_v17, 0.0  ;;  %v425_v29 = vmax.f32 %v409_v19, 0.0  ;;  %v399_v30 = vadd.f32 %v383_v12, %v367_v20 }
  0xf2   :  { %v407_v31 = vadd.f32 %v391_v13, %v375_v21  ;;  %428 = vst [vmem:[%s766_s5 + $0x8] sm:$0xff] %v412_v22  ;;  %v370_v34 = vadd.f32 %v631_v18, %v347_v24  ;;  %v378_v35 = vadd.f32 %v631_v18, %v355_v25  ;;  %v345_v36 = vmul.f32 %v626_v16, %v238_v26 }
  0xf3   :  { %436 = vst [vmem:[%s766_s5 + $0x48] sm:$0xff] %v420_v23  ;;  %v353_v37 = vmul.f32 %v626_v16, %v270_v27  ;;  %433 = vst [vmem:[%s766_s5 + $0x30] sm:$0xff] %v417_v28  ;;  %v415_v38 = vmax.f32 %v399_v30, 0.0 }
  0xf4   :  { %441 = vst [vmem:[%s766_s5 + $0x70] sm:$0xff] %v425_v29  ;;  %v423_v39 = vmax.f32 %v407_v31, 0.0  ;;  %v402_v42 = vadd.f32 %v386_v32, %v370_v34  ;;  %v410_v16 = vadd.f32 %v394_v33, %v378_v35  ;;  %v368_v43 = vadd.f32 %v631_v18, %v345_v36 }
  0xf5   :  { %v376_v44 = vadd.f32 %v631_v18, %v353_v37  ;;  %431 = vst [vmem:[%s766_s5 + $0x20] sm:$0xff] %v415_v38 }
  0xf6   :  { %439 = vst [vmem:[%s766_s5 + $0x60] sm:$0xff] %v423_v39  ;;  %v418_v45 = vmax.f32 %v402_v42, 0.0  ;;  %v426_v46 = vmax.f32 %v410_v16, 0.0  ;;  %v400_v47 = vadd.f32 %v384_v40, %v368_v43 }
  0xf7   :  { %v408_v48 = vadd.f32 %v392_v41, %v376_v44 }
  0xf8   :  { %434 = vst [vmem:[%s766_s5 + $0x38] sm:$0xff] %v418_v45  ;;  %442 = vst [vmem:[%s766_s5 + $0x78] sm:$0xff] %v426_v46  ;;  %v416_v18 = vmax.f32 %v400_v47, 0.0 }
  0xf9   :  { %v424_v49 = vmax.f32 %v408_v48, 0.0 }
  0xfa   :  { %432 = vst [vmem:[%s766_s5 + $0x28] sm:$0xff] %v416_v18 }
  0xfb   :  { %440 = vst [vmem:[%s766_s5 + $0x68] sm:$0xff] %v424_v49 }

</bundles_post_ra>
